<compile_context>
chip_gen: v7x
topology: tpu7x:2x2x1
jax: 0.10.0
libtpu: 0.0.40
codegen_flags: <defaults>
</compile_context>

<pallas_src>
import jax
import jax.numpy as jnp
from jax.experimental import pallas as pl
from jax.experimental.pallas import tpu as pltpu

_LANE = 512       # lane-dense last dim, multiple of 128
_ROW_TILE = 512   # sublane tile, multiple of 8 -> 1 MiB per f32 input tile


def _dot_kernel(x_ref, y_ref, o_ref):
    # Hot path: elementwise multiply on the VPU over the VMEM tile.
    # Dtype promotion/cast happens here so the wrapper never materializes copies.
    o_ref[...] = (x_ref[...] * y_ref[...]).astype(o_ref.dtype)


def _round_up(n: int, m: int) -> int:
    return ((n + m - 1) // m) * m


def dot(x: jax.Array, y: jax.Array) -> jax.Array:
    """Elementwise product x * y, matching torch broadcasting/promotion semantics."""
    out_shape = jnp.broadcast_shapes(x.shape, y.shape)
    out_dtype = jnp.result_type(x.dtype, y.dtype)

    # Only materialize a broadcast when shapes genuinely differ (Dot is used with
    # same-shape feature maps, so this path is normally skipped entirely).
    if tuple(x.shape) != tuple(out_shape):
        x = jnp.broadcast_to(x, out_shape)
    if tuple(y.shape) != tuple(out_shape):
        y = jnp.broadcast_to(y, out_shape)

    n = 1
    for d in out_shape:
        n *= int(d)
    if n == 0:
        return jnp.zeros(out_shape, out_dtype)

    # Flatten to a lane-dense 2-D slab (rows, _LANE); pad only when required.
    rows = pl.cdiv(n, _LANE)
    rows_pad = _round_up(rows, 8)
    n_pad = rows_pad * _LANE

    xf = x.reshape(-1)
    yf = y.reshape(-1)
    if n_pad != n:
        xf = jnp.pad(xf, (0, n_pad - n))
        yf = jnp.pad(yf, (0, n_pad - n))

    x2 = xf.reshape(rows_pad, _LANE)
    y2 = yf.reshape(rows_pad, _LANE)

    tr = min(_ROW_TILE, rows_pad)          # both multiples of 8
    grid = (pl.cdiv(rows_pad, tr),)

    bytes_accessed = n * (
        x.dtype.itemsize + y.dtype.itemsize + jnp.dtype(out_dtype).itemsize
    )

    out2 = pl.pallas_call(
        _dot_kernel,
        out_shape=jax.ShapeDtypeStruct((rows_pad, _LANE), out_dtype),
        grid=grid,
        in_specs=[
            pl.BlockSpec((tr, _LANE), lambda i: (i, 0)),
            pl.BlockSpec((tr, _LANE), lambda i: (i, 0)),
        ],
        out_specs=pl.BlockSpec((tr, _LANE), lambda i: (i, 0)),
        compiler_params=pltpu.CompilerParams(
            dimension_semantics=("parallel",),
        ),
        cost_estimate=pl.CostEstimate(
            flops=n, transcendentals=0, bytes_accessed=bytes_accessed
        ),
    )(x2, y2)

    out_flat = out2.reshape(-1)
    if n_pad != n:
        out_flat = out_flat[:n]
    return out_flat.reshape(out_shape)


if __name__ == "__main__":
    key = jax.random.PRNGKey(0)
    kx, ky = jax.random.split(key)
    # Small NCHW shapes consistent with how Dot is used on conv feature maps.
    x = jax.random.normal(kx, (2, 4, 16, 16), dtype=jnp.float32)
    y = jax.random.normal(ky, (2, 4, 16, 16), dtype=jnp.float32)

    out = jax.block_until_ready(dot(x, y))

    # Reference check against plain JAX (== torch semantics for x * y).
    ref = x * y
    assert out.shape == ref.shape and out.dtype == ref.dtype
    assert jnp.allclose(out, ref, atol=1e-6, rtol=1e-6)

    print("KERNEL_OK")
</pallas_src>

<mosaic_0001>
module attributes {stable_mosaic.version = 11 : i64} {
  func.func @_dot_kernel(%arg0: i32, %arg1: memref<8x512xf32, #tpu.memory_space<vmem>>, %arg2: memref<8x512xf32, #tpu.memory_space<vmem>>, %arg3: memref<8x512xf32, #tpu.memory_space<vmem>>) attributes {dimension_semantics = [#tpu.dimension_semantics<parallel>], iteration_bounds = array<i64: 1>, scalar_prefetch = 0 : i64, scratch_operands = 0 : i64, tpu.core_type = #tpu.core_type<tc>, window_params = [{transform_indices = @transform_0, window_bounds = array<i64: 8, 512>}, {transform_indices = @transform_1, window_bounds = array<i64: 8, 512>}, {transform_indices = @transform_2, window_bounds = array<i64: 8, 512>}]} {
    %c0 = arith.constant 0 : index
    %c0_0 = arith.constant 0 : index
    %0 = vector.load %arg1[%c0, %c0_0] : memref<8x512xf32, #tpu.memory_space<vmem>>, vector<8x512xf32>
    %c0_1 = arith.constant 0 : index
    %c0_2 = arith.constant 0 : index
    %1 = vector.load %arg2[%c0_1, %c0_2] : memref<8x512xf32, #tpu.memory_space<vmem>>, vector<8x512xf32>
    %2 = arith.mulf %0, %1 : vector<8x512xf32>
    %c0_3 = arith.constant 0 : index
    %c0_4 = arith.constant 0 : index
    %3 = vector.load %arg3[%c0_3, %c0_4] : memref<8x512xf32, #tpu.memory_space<vmem>>, vector<8x512xf32>
    tpu.vector_store %arg3[%c0_3, %c0_4], %2 {strides = array<i32>} : memref<8x512xf32, #tpu.memory_space<vmem>>, vector<8x512xf32>,
    return
  }
  func.func @transform_0(%arg0: i32) -> (i32, i32) {
    %c0_i32 = arith.constant 0 : i32
    %c0_i32_0 = arith.constant 0 : i32
    return %arg0, %c0_i32 : i32, i32
  }
  func.func @transform_1(%arg0: i32) -> (i32, i32) {
    %c0_i32 = arith.constant 0 : i32
    %c0_i32_0 = arith.constant 0 : i32
    return %arg0, %c0_i32 : i32, i32
  }
  func.func @transform_2(%arg0: i32) -> (i32, i32) {
    %c0_i32 = arith.constant 0 : i32
    %c0_i32_0 = arith.constant 0 : i32
    return %arg0, %c0_i32 : i32, i32
  }
}

</mosaic_0001>

<bundles_post_ra>
// kernel: tpu_custom_call.1
= control target key start
LH: loop header
LB: loop body
LE: loop exit
PB: predicated region body
PF: predicated region fallthrough
CT: control target
= control target key end

     0   :  { %7 = vsyncpa [#allocation3], 0  ;;  %s197_s0 = inlined_call_operand.hbm [shape: f32[8,512], index: 0, kind: input, shape index: {}]   ;;  %s198_s1 = inlined_call_operand.hbm [shape: f32[8,512], index: 1, kind: input, shape index: {}]   ;;  %s199_s2 = inlined_call_operand.hbm [shape: f32[8,512], index: 2, kind: output, shape index: {}]  }
   0x1   :  { %8 = vsyncpa [#allocation6], 0 }
   0x2   :  { %9 = vsyncpa [#allocation4], 0  ;;  %s143_s9 = smov [#allocation2]   ;;  %s144_s11 = smov [#allocation5]  }
   0x3   :  { %s16_s10 = sshll.u32 %s143_s9, 4  ;;  %s26_s12 = sshll.u32 %s144_s11, 4  ;;  %s17_s10 = int_to_ptr.vmem [resolvable:$true] %s16_s10  ;;  %s27_s12 = int_to_ptr.vmem [resolvable:$true] %s26_s12 }
   0x4   :  { %s71_s15 = scalar_lea.hbm %s197_s0, 512 }
   0x5   :  { %p72_p0 = scmp.ne.s32.totalorder %s197_s0, %s71_s15  ;;  %p75_p1 = scmp.lt.u32.totalorder %s71_s15, %s197_s0 }
   0x7   :  { %p77_p2 = pnand %p75_p1, %p72_p0 }
   0x9   :  { %80 = shalt.err (!%p77_p2)
}
   0xa   :  { %s81_s20 = scalar_lea.vmem %s17_s10, 512  ;;  %p86_p4 = scmp.lt.s32.totalorder %s17_s10, %s17_s10 }
   0xb   :  { %p82_p3 = scmp.ne.s32.totalorder %s17_s10, %s81_s20  ;;  %p87_p5 = scmp.lt.s32.totalorder %s81_s20, %s81_s20 }
   0xd   :  { %p88_p6 = por %p87_p5, %p86_p4 }
   0xf   :  { %p89_p7 = pnand %p88_p6, %p82_p3 }
  0x11   :  { %92 = shalt.err (!%p89_p7)
}
  0x12   :  { %19 = dma.hbm_to_vmem [thread:$0]  %s197_s0, 512, %s17_s10, [#allocation3]  }
  0x13   :  { %s93_s25 = scalar_lea.hbm %s198_s1, 512 }
  0x14   :  { %p94_p8 = scmp.ne.s32.totalorder %s198_s1, %s93_s25  ;;  %p97_p9 = scmp.lt.u32.totalorder %s93_s25, %s198_s1 }
  0x16   :  { %p99_p10 = pnand %p97_p9, %p94_p8 }
  0x18   :  { %102 = shalt.err (!%p99_p10)
}
  0x19   :  { %s103_s30 = scalar_lea.vmem %s27_s12, 512  ;;  %p108_p12 = scmp.lt.s32.totalorder %s27_s12, %s27_s12 }
  0x1a   :  { %p104_p11 = scmp.ne.s32.totalorder %s27_s12, %s103_s30  ;;  %p109_p13 = scmp.lt.s32.totalorder %s103_s30, %s103_s30 }
  0x1c   :  { %p110_p0 = por %p109_p13, %p108_p12 }
  0x1e   :  { %p111_p1 = pnand %p110_p0, %p104_p11 }
  0x20   :  { %114 = shalt.err (!%p111_p1)
}
  0x21   :  { %29 = dma.hbm_to_vmem [thread:$0]  %s198_s1, 512, %s27_s12, [#allocation6]  }
  0x22   :  { %137 = dma.done.wait [#allocation3], 512  }
  0x23   :  { %138 = vsyncadd [#allocation3], 4294966784 }
  0x24   :  { %139 = dma.done.wait [#allocation6], 512  }
  0x25   :  { %140 = vsyncadd [#allocation6], 4294966784  ;;  %v36_v0 = vld [vmem:[#allocation2] sm:$0xff]  ;;  %v37_v2 = vld [vmem:[#allocation2 + $0x8] sm:$0xff]  ;;  %s145_s4 = smov [#allocation7]  }
  0x26   :  { %v40_v1 = vld [vmem:[#allocation5] sm:$0xff]  ;;  %s58_s5 = sshll.u32 %s145_s4, 4  ;;  %v41_v4 = vld [vmem:[#allocation5 + $0x8] sm:$0xff]  ;;  %v38_v5 = vld [vmem:[#allocation2 + $0x10] sm:$0xff]  ;;  %s59_s5 = int_to_ptr.vmem [resolvable:$true] %s58_s5 }
  0x27   :  { %v44_v3 = vmul.f32 %v40_v1, %v36_v0  ;;  %v42_v6 = vld [vmem:[#allocation5 + $0x10] sm:$0xff]  ;;  %v45_v7 = vmul.f32 %v41_v4, %v37_v2  ;;  %v39_v9 = vld [vmem:[#allocation2 + $0x18] sm:$0xff]  ;;  %s115_s1 = scalar_lea.vmem %s59_s5, 512  ;;  %p120_p3 = scmp.lt.s32.totalorder %s59_s5, %s59_s5 }
  0x28   :  { %v46_v8 = vmul.f32 %v42_v6, %v38_v5  ;;  %v43_v10 = vld [vmem:[#allocation5 + $0x18] sm:$0xff]  ;;  %p116_p2 = scmp.ne.s32.totalorder %s59_s5, %s115_s1  ;;  %p121_p4 = scmp.lt.s32.totalorder %s115_s1, %s115_s1 }
  0x29   :  { %48 = vst [vmem:[#allocation7] sm:$0xff] %v44_v3  ;;  %v47_v11 = vmul.f32 %v43_v10, %v39_v9  ;;  %49 = vst [vmem:[#allocation7 + $0x8] sm:$0xff] %v45_v7 }
  0x2a   :  { %50 = vst [vmem:[#allocation7 + $0x10] sm:$0xff] %v46_v8  ;;  %p122_p5 = por %p121_p4, %p120_p3 }
  0x2b   :  { %51 = vst [vmem:[#allocation7 + $0x18] sm:$0xff] %v47_v11 }
  0x2c   :  { %p123_p6 = pnand %p122_p5, %p116_p2 }
  0x2e   :  { %126 = shalt.err (!%p123_p6)
}
  0x2f   :  { %s127_s8 = scalar_lea.hbm %s199_s2, 512 }
  0x30   :  { %p128_p7 = scmp.ne.s32.totalorder %s199_s2, %s127_s8  ;;  %p131_p8 = scmp.lt.u32.totalorder %s127_s8, %s199_s2 }
  0x32   :  { %p133_p9 = pnand %p131_p8, %p128_p7 }
  0x34   :  { %136 = shalt.err (!%p133_p9)
}
  0x35   :  { %61 = dma.vmem_to_hbm [thread:$0]  %s59_s5, 512, %s199_s2, [#allocation4]  }
  0x36   :  { %141 = dma.done.wait [#allocation4], 512  }
  0x37   :  { %142 = vsyncadd [#allocation4], 4294966784 }
  0x38   :  { %65 = vsyncpa [#allocation3], 1 }
  0x39   :  { %66 = vsyncpa [#allocation6], 1 }
  0x3a   :  { %67 = vsyncpa [#allocation4], 1 }

</bundles_post_ra>
